<compile_context>
chip_gen: v5e
topology: v5e:2x2
jax: 0.10.0
libtpu: 0.0.40
codegen_flags: <defaults>
</compile_context>

<pallas_src>
import math

import jax
import jax.numpy as jnp
from jax.experimental import pallas as pl
from jax.experimental.pallas import tpu as pltpu


def _cdiv(a, b):
    return -(-a // b)


def _tpu_generation_info():
    """Best-effort (vmem_capacity_bytes, num_tensorcores) for the local chip."""
    kind = ""
    try:
        kind = jax.devices()[0].device_kind.lower()
    except Exception:
        pass
    is_v7 = ("v7" in kind) or ("7x" in kind)
    vmem = (64 if is_v7 else 128) * 1024 * 1024
    try:
        info = pltpu.get_tpu_info()
        vmem = int(getattr(info, "vmem_capacity_bytes", vmem))
    except Exception:
        pass
    # v4/v5p megacore and v7x expose 2 TensorCores to one program; v5e/v6e are
    # single-core, where a 'parallel' chunk axis is pure overhead.
    cores = 2 if (is_v7 or "v4" in kind or "v5p" in kind) else 1
    return vmem, cores


def _make_dice_kernel(*, steps, tkb, kb_total, nb, n, binary_target, tail,
                      finalize, eps, loss_weight):
    """Build the kernel body; all arguments are static Python values."""

    def kernel(pred_ref, tgt_ref, out_ref, a_sc, b_sc, c_sc):
        s = pl.program_id(1)

        @pl.when(s == 0)
        def _init():
            a_sc[...] = jnp.zeros_like(a_sc)
            b_sc[...] = jnp.zeros_like(b_sc)
            c_sc[...] = jnp.zeros_like(c_sc)

        p = jax.nn.sigmoid(pred_ref[...].astype(jnp.float32))   # (n, tkb, 128)
        t = tgt_ref[...].astype(jnp.float32)                    # (n, tkb, 128)

        def accumulate(p_blk, t_blk):
            # Sublane-axis reduce only; the cross-lane (128) reduce is deferred
            # to the epilogue (runs once, on the otherwise-idle XLU).
            a_sc[...] += jnp.sum(p_blk * t_blk, axis=1)
            b_sc[...] += jnp.sum(p_blk * p_blk, axis=1)
            if binary_target:
                c_sc[...] += jnp.sum(t_blk, axis=1)       # t in {0,1}: t*t == t
            else:
                c_sc[...] += jnp.sum(t_blk * t_blk, axis=1)

        if tail:
            # Grid coverage overhangs kb_total: mask overhanging / duplicated
            # blocks here instead of padding pred/target in HBM.  Full blocks
            # take the unmasked fast path (pl.when-gated).
            lin = pl.program_id(0) * steps + s        # logical linear block id
            start = jnp.minimum(lin, nb - 1) * tkb    # matches index_map clamp
            owns = lin < nb
            full = jnp.logical_and(owns, start + tkb <= kb_total)

            @pl.when(full)
            def _fast():
                accumulate(p, t)

            @pl.when(jnp.logical_not(full))
            def _masked():
                row = jax.lax.broadcasted_iota(jnp.int32, (tkb, 128), 0)
                valid = jnp.logical_and(owns, (start + row) < kb_total)[None]
                accumulate(jnp.where(valid, p, 0.0), jnp.where(valid, t, 0.0))
        else:
            accumulate(p, t)

        @pl.when(s == steps - 1)
        def _epilogue():
            a = jnp.sum(a_sc[...], axis=-1, keepdims=True)   # (n, 1)
            b = jnp.sum(b_sc[...], axis=-1, keepdims=True)
            c = jnp.sum(c_sc[...], axis=-1, keepdims=True)
            if finalize:
                per_sample = 1.0 - 2.0 * a / ((b + eps) + (c + eps))  # (n, 1)
                out_ref[...] = (jnp.sum(per_sample, axis=0, keepdims=True)
                                * (loss_weight / n))
            else:
                out_ref[0, :, 0:1] = a
                out_ref[0, :, 1:2] = b
                out_ref[0, :, 2:3] = c

    return kernel


def custom_dice_loss(pred, target, *, eps=1e-3, loss_weight=1.0,
                     num_parallel_chunks=None, max_block_kb=2048,
                     vmem_budget_bytes=None):
    """Dice loss forward (use_sigmoid=True, activate=True, reduction='mean')."""
    assert pred.shape == target.shape, (pred.shape, target.shape)
    n = pred.shape[0]
    k_total = int(math.prod(pred.shape[1:])) if pred.ndim > 1 else 1

    pred2d = pred.reshape(n, k_total)
    tgt2d = target.reshape(n, k_total)
    binary_target = (tgt2d.dtype == jnp.bool_)   # keep bool narrow in HBM

    # Fold K into a lane/sublane-packed (n, KB, 128) view.  The reshape is free
    # when K is a multiple of 128; only a sub-128 remainder is padded
    # (pred pad -> sigmoid == 0 exactly, target pad == 0).
    rem = k_total % 128
    if rem:
        # TODO(synk): this rare path still pays one padded HBM copy; typical
        # BEV shapes (C*H*W a multiple of 128) never take it.
        pad = 128 - rem
        if jnp.issubdtype(pred2d.dtype, jnp.floating):
            pad_val = float(jnp.finfo(pred2d.dtype).min)
        else:
            pad_val = int(jnp.iinfo(pred2d.dtype).min)
        pred2d = jnp.pad(pred2d, ((0, 0), (0, pad)), constant_values=pad_val)
        tgt2d = jnp.pad(tgt2d, ((0, 0), (0, pad)))
        k_total += pad
    kb_total = k_total // 128
    pred3d = pred2d.reshape(n, kb_total, 128)
    tgt3d = tgt2d.reshape(n, kb_total, 128)

    pred_b = jnp.dtype(pred3d.dtype).itemsize
    tgt_b = jnp.dtype(tgt3d.dtype).itemsize

    # --- generation-aware tiling --------------------------------------------
    vmem_cap, num_cores = _tpu_generation_info()
    budget = int(vmem_budget_bytes) if vmem_budget_bytes else (vmem_cap * 3) // 8
    # Working set per unit of tkb: double-buffered input blocks plus ~6 block
    # sized f32 intermediates Mosaic may keep live in VMEM.
    per_tkb = n * 128 * (2 * (pred_b + tgt_b) + 6 * 4)
    tkb_cap = min(int(max_block_kb), max(32, (budget // per_tkb) // 32 * 32))

    if kb_total <= tkb_cap:
        tkb, nb, chunks, steps = kb_total, 1, 1, 1          # single-block path
    else:
        tkb = tkb_cap
        nb = _cdiv(kb_total, tkb)
        if num_parallel_chunks is None:
            chunks = num_cores
        else:
            chunks = max(1, int(num_parallel_chunks))
        chunks = min(chunks, nb)
        steps = _cdiv(nb, chunks)

    tail = (chunks * steps * tkb) != kb_total
    finalize = (chunks == 1)

    block_in = n * tkb * 128 * (pred_b + tgt_b)
    est = 2 * block_in + 8 * n * tkb * 128 * 4 + (2 << 20)
    vmem_limit = int(min(max(32 * 1024 * 1024, est * 3 // 2), (vmem_cap * 3) // 4))

    if tail:
        def in_map(c, s):
            return (0, jnp.minimum(c * steps + s, nb - 1), 0)
    else:
        def in_map(c, s):
            return (0, c * steps + s, 0)

    if finalize:
        out_shape = jax.ShapeDtypeStruct((1, 1), jnp.float32)
        out_spec = pl.BlockSpec((1, 1), lambda c, s: (0, 0))
    else:
        out_shape = jax.ShapeDtypeStruct((chunks, n, 3), jnp.float32)
        out_spec = pl.BlockSpec((1, n, 3), lambda c, s: (c, 0, 0))

    kernel = _make_dice_kernel(
        steps=steps, tkb=tkb, kb_total=kb_total, nb=nb, n=n,
        binary_target=binary_target, tail=tail, finalize=finalize,
        eps=float(eps), loss_weight=float(loss_weight))

    out = pl.pallas_call(
        kernel,
        out_shape=out_shape,
        grid_spec=pltpu.PrefetchScalarGridSpec(
            num_scalar_prefetch=0,
            grid=(chunks, steps),
            in_specs=[pl.BlockSpec((n, tkb, 128), in_map),
                      pl.BlockSpec((n, tkb, 128), in_map)],
            out_specs=out_spec,
            scratch_shapes=[pltpu.VMEM((n, 128), jnp.float32) for _ in range(3)],
        ),
        compiler_params=pltpu.CompilerParams(
            dimension_semantics=("parallel", "arbitrary"),
            vmem_limit_bytes=vmem_limit,
        ),
    )(pred3d, tgt3d)

    if finalize:
        return out[0, 0]

    # Tiny epilogue (only for >1 K-chunks): combine per-chunk partial sums.
    sums = jnp.sum(out, axis=0)                   # (n, 3)
    a = sums[:, 0]
    b = sums[:, 1] + eps
    c = sums[:, 2] + eps
    loss = 1.0 - 2.0 * a / (b + c)
    return loss_weight * jnp.mean(loss)


def _reference(pred, target, eps=1e-3, loss_weight=1.0):
    n = pred.shape[0]
    p = jax.nn.sigmoid(pred.reshape(n, -1).astype(jnp.float32))
    t = target.reshape(n, -1).astype(jnp.float32)
    a = jnp.sum(p * t, axis=1)
    b = jnp.sum(p * p, axis=1) + eps
    c = jnp.sum(t * t, axis=1) + eps
    loss = 1.0 - 2.0 * a / (b + c)
    return loss_weight * jnp.mean(loss)


if __name__ == "__main__":
    key = jax.random.PRNGKey(0)
    k1, k2, k3, k4, k5, k6 = jax.random.split(key, 6)

    # 1) Small BEV-head shape (K = 4*16*16 = 1024): single-block path, dice
    #    finished entirely in-kernel (scalar output), float32 {0,1} target.
    N, C, H, W = 2, 4, 16, 16
    pred = jax.random.normal(k1, (N, C, H, W), dtype=jnp.float32)
    target = (jax.random.uniform(k2, (N, C, H, W)) > 0.5).astype(jnp.float32)
    out = jax.block_until_ready(custom_dice_loss(pred, target))
    ref = jax.block_until_ready(_reference(pred, target))
    assert jnp.allclose(out, ref, atol=1e-5, rtol=1e-5), (out, ref)

    # 2) Larger K (4*48*48 = 9216 -> kb = 72) with a small forced block so the
    #    tiled path + in-kernel ragged-tail masking runs; bool target kept
    #    bool in HBM (binary fast path: sum(t) instead of sum(t*t)).
    pred2 = jax.random.normal(k3, (2, 4, 48, 48), dtype=jnp.float32)
    target2 = jax.random.uniform(k4, (2, 4, 48, 48)) > 0.5
    out2 = jax.block_until_ready(custom_dice_loss(pred2, target2, max_block_kb=32))
    ref2 = jax.block_until_ready(_reference(pred2, target2))
    assert jnp.allclose(out2, ref2, atol=1e-5, rtol=1e-5), (out2, ref2)

    # 3) Same data with 2 forced K-chunks: exercises the multi-chunk per-chunk
    #    partial-sum output path, including fully-masked duplicate blocks.
    out3 = jax.block_until_ready(
        custom_dice_loss(pred2, target2, max_block_kb=32, num_parallel_chunks=2))
    assert jnp.allclose(out3, ref2, atol=1e-5, rtol=1e-5), (out3, ref2)

    # 4) K not a multiple of 128 (2*3*10*10 = 300): minimal-pad fallback path.
    pred4 = jax.random.normal(k5, (2, 3, 10, 10), dtype=jnp.float32)
    target4 = (jax.random.uniform(k6, (2, 3, 10, 10)) > 0.5).astype(jnp.float32)
    out4 = jax.block_until_ready(custom_dice_loss(pred4, target4))
    ref4 = jax.block_until_ready(_reference(pred4, target4))
    assert jnp.allclose(out4, ref4, atol=1e-5, rtol=1e-5), (out4, ref4)

    print("KERNEL_OK")
</pallas_src>

<mosaic_0001>
module attributes {stable_mosaic.version = 11 : i64} {
  func.func @kernel(%arg0: i32, %arg1: i32, %arg2: memref<2x8x128xf32, #tpu.memory_space<vmem>>, %arg3: memref<2x8x128xf32, #tpu.memory_space<vmem>>, %arg4: memref<1x1xf32, #tpu.memory_space<vmem>>, %arg5: memref<2x128xf32, #tpu.memory_space<vmem>>, %arg6: memref<2x128xf32, #tpu.memory_space<vmem>>, %arg7: memref<2x128xf32, #tpu.memory_space<vmem>>) attributes {dimension_semantics = [#tpu.dimension_semantics<parallel>, #tpu.dimension_semantics<arbitrary>], iteration_bounds = array<i64: 1, 1>, scalar_prefetch = 0 : i64, scratch_operands = 3 : i64, tpu.core_type = #tpu.core_type<tc>, window_params = [{transform_indices = @transform_0, window_bounds = array<i64: 2, 8, 128>}, {transform_indices = @transform_1, window_bounds = array<i64: 2, 8, 128>}, {pipeline_mode = #tpu.pipeline_mode<synchronous>, transform_indices = @transform_2, window_bounds = array<i64: 1, 1>}]} {
    %c0_i32 = arith.constant 0 : i32
    %0 = arith.cmpi eq, %arg1, %c0_i32 : i32
    %1 = arith.extui %0 : i1 to i32
    %c0_i32_0 = arith.constant 0 : i32
    %2 = arith.cmpi ne, %1, %c0_i32_0 : i32
    scf.if %2 {
      %cst_23 = arith.constant 0.000000e+00 : f32
      %28 = vector.broadcast %cst_23 : f32 to vector<2x128xf32>
      %c0_24 = arith.constant 0 : index
      %c0_25 = arith.constant 0 : index
      %29 = vector.load %arg5[%c0_24, %c0_25] : memref<2x128xf32, #tpu.memory_space<vmem>>, vector<2x128xf32>
      tpu.vector_store %arg5[%c0_24, %c0_25], %28 {strides = array<i32>} : memref<2x128xf32, #tpu.memory_space<vmem>>, vector<2x128xf32>,
      %cst_26 = arith.constant 0.000000e+00 : f32
      %30 = vector.broadcast %cst_26 : f32 to vector<2x128xf32>
      %c0_27 = arith.constant 0 : index
      %c0_28 = arith.constant 0 : index
      %31 = vector.load %arg6[%c0_27, %c0_28] : memref<2x128xf32, #tpu.memory_space<vmem>>, vector<2x128xf32>
      tpu.vector_store %arg6[%c0_27, %c0_28], %30 {strides = array<i32>} : memref<2x128xf32, #tpu.memory_space<vmem>>, vector<2x128xf32>,
      %cst_29 = arith.constant 0.000000e+00 : f32
      %32 = vector.broadcast %cst_29 : f32 to vector<2x128xf32>
      %c0_30 = arith.constant 0 : index
      %c0_31 = arith.constant 0 : index
      %33 = vector.load %arg7[%c0_30, %c0_31] : memref<2x128xf32, #tpu.memory_space<vmem>>, vector<2x128xf32>
      tpu.vector_store %arg7[%c0_30, %c0_31], %32 {strides = array<i32>} : memref<2x128xf32, #tpu.memory_space<vmem>>, vector<2x128xf32>,
    } else {
    }
    %c0 = arith.constant 0 : index
    %c0_1 = arith.constant 0 : index
    %c0_2 = arith.constant 0 : index
    %3 = vector.load %arg2[%c0, %c0_1, %c0_2] : memref<2x8x128xf32, #tpu.memory_space<vmem>>, vector<2x8x128xf32>
    %4 = arith.negf %3 : vector<2x8x128xf32>
    %5 = math.exp %4 : vector<2x8x128xf32>
    %cst = arith.constant 1.000000e+00 : f32
    %6 = vector.broadcast %cst : f32 to vector<2x8x128xf32>
    %7 = arith.addf %6, %5 : vector<2x8x128xf32>
    %8 = arith.divf %6, %7 : vector<2x8x128xf32>
    %c0_3 = arith.constant 0 : index
    %c0_4 = arith.constant 0 : index
    %c0_5 = arith.constant 0 : index
    %9 = vector.load %arg3[%c0_3, %c0_4, %c0_5] : memref<2x8x128xf32, #tpu.memory_space<vmem>>, vector<2x8x128xf32>
    %c0_6 = arith.constant 0 : index
    %c0_7 = arith.constant 0 : index
    %10 = vector.load %arg5[%c0_6, %c0_7] : memref<2x128xf32, #tpu.memory_space<vmem>>, vector<2x128xf32>
    %11 = arith.mulf %8, %9 : vector<2x8x128xf32>
    %cst_8 = arith.constant dense<0.000000e+00> : vector<2x128xf32>
    %12 = vector.multi_reduction <add>, %11, %cst_8 [1] : vector<2x8x128xf32> to vector<2x128xf32>
    %13 = arith.addf %10, %12 : vector<2x128xf32>
    %c0_9 = arith.constant 0 : index
    %c0_10 = arith.constant 0 : index
    %14 = vector.load %arg5[%c0_9, %c0_10] : memref<2x128xf32, #tpu.memory_space<vmem>>, vector<2x128xf32>
    tpu.vector_store %arg5[%c0_9, %c0_10], %13 {strides = array<i32>} : memref<2x128xf32, #tpu.memory_space<vmem>>, vector<2x128xf32>,
    %c0_11 = arith.constant 0 : index
    %c0_12 = arith.constant 0 : index
    %15 = vector.load %arg6[%c0_11, %c0_12] : memref<2x128xf32, #tpu.memory_space<vmem>>, vector<2x128xf32>
    %16 = arith.mulf %8, %8 : vector<2x8x128xf32>
    %cst_13 = arith.constant dense<0.000000e+00> : vector<2x128xf32>
    %17 = vector.multi_reduction <add>, %16, %cst_13 [1] : vector<2x8x128xf32> to vector<2x128xf32>
    %18 = arith.addf %15, %17 : vector<2x128xf32>
    %c0_14 = arith.constant 0 : index
    %c0_15 = arith.constant 0 : index
    %19 = vector.load %arg6[%c0_14, %c0_15] : memref<2x128xf32, #tpu.memory_space<vmem>>, vector<2x128xf32>
    tpu.vector_store %arg6[%c0_14, %c0_15], %18 {strides = array<i32>} : memref<2x128xf32, #tpu.memory_space<vmem>>, vector<2x128xf32>,
    %c0_16 = arith.constant 0 : index
    %c0_17 = arith.constant 0 : index
    %20 = vector.load %arg7[%c0_16, %c0_17] : memref<2x128xf32, #tpu.memory_space<vmem>>, vector<2x128xf32>
    %21 = arith.mulf %9, %9 : vector<2x8x128xf32>
    %cst_18 = arith.constant dense<0.000000e+00> : vector<2x128xf32>
    %22 = vector.multi_reduction <add>, %21, %cst_18 [1] : vector<2x8x128xf32> to vector<2x128xf32>
    %23 = arith.addf %20, %22 : vector<2x128xf32>
    %c0_19 = arith.constant 0 : index
    %c0_20 = arith.constant 0 : index
    %24 = vector.load %arg7[%c0_19, %c0_20] : memref<2x128xf32, #tpu.memory_space<vmem>>, vector<2x128xf32>
    tpu.vector_store %arg7[%c0_19, %c0_20], %23 {strides = array<i32>} : memref<2x128xf32, #tpu.memory_space<vmem>>, vector<2x128xf32>,
    %c0_i32_21 = arith.constant 0 : i32
    %25 = arith.cmpi eq, %arg1, %c0_i32_21 : i32
    %26 = arith.extui %25 : i1 to i32
    %c0_i32_22 = arith.constant 0 : i32
    %27 = arith.cmpi ne, %26, %c0_i32_22 : i32
    scf.if %27 {
      %c0_23 = arith.constant 0 : index
      %c0_24 = arith.constant 0 : index
      %28 = vector.load %arg5[%c0_23, %c0_24] : memref<2x128xf32, #tpu.memory_space<vmem>>, vector<2x128xf32>
      %cst_25 = arith.constant dense<0.000000e+00> : vector<2xf32>
      %29 = vector.multi_reduction <add>, %28, %cst_25 [1] : vector<2x128xf32> to vector<2xf32>
      %30 = vector.shape_cast %29 : vector<2xf32> to vector<2x1xf32>
      %c0_26 = arith.constant 0 : index
      %c0_27 = arith.constant 0 : index
      %31 = vector.load %arg6[%c0_26, %c0_27] : memref<2x128xf32, #tpu.memory_space<vmem>>, vector<2x128xf32>
      %cst_28 = arith.constant dense<0.000000e+00> : vector<2xf32>
      %32 = vector.multi_reduction <add>, %31, %cst_28 [1] : vector<2x128xf32> to vector<2xf32>
      %33 = vector.shape_cast %32 : vector<2xf32> to vector<2x1xf32>
      %c0_29 = arith.constant 0 : index
      %c0_30 = arith.constant 0 : index
      %34 = vector.load %arg7[%c0_29, %c0_30] : memref<2x128xf32, #tpu.memory_space<vmem>>, vector<2x128xf32>
      %cst_31 = arith.constant dense<0.000000e+00> : vector<2xf32>
      %35 = vector.multi_reduction <add>, %34, %cst_31 [1] : vector<2x128xf32> to vector<2xf32>
      %36 = vector.shape_cast %35 : vector<2xf32> to vector<2x1xf32>
      %cst_32 = arith.constant 2.000000e+00 : f32
      %37 = vector.broadcast %cst_32 : f32 to vector<2x1xf32>
      %38 = arith.mulf %37, %30 : vector<2x1xf32>
      %cst_33 = arith.constant 1.000000e-03 : f32
      %39 = vector.broadcast %cst_33 : f32 to vector<2x1xf32>
      %40 = arith.addf %33, %39 : vector<2x1xf32>
      %cst_34 = arith.constant 1.000000e-03 : f32
      %41 = vector.broadcast %cst_34 : f32 to vector<2x1xf32>
      %42 = arith.addf %36, %41 : vector<2x1xf32>
      %43 = arith.addf %40, %42 : vector<2x1xf32>
      %44 = arith.divf %38, %43 : vector<2x1xf32>
      %cst_35 = arith.constant 1.000000e+00 : f32
      %45 = vector.broadcast %cst_35 : f32 to vector<2x1xf32>
      %46 = arith.subf %45, %44 : vector<2x1xf32>
      %cst_36 = arith.constant dense<0.000000e+00> : vector<1xf32>
      %47 = vector.multi_reduction <add>, %46, %cst_36 [0] : vector<2x1xf32> to vector<1xf32>
      %48 = vector.shape_cast %47 : vector<1xf32> to vector<1x1xf32>
      %cst_37 = arith.constant 5.000000e-01 : f32
      %49 = vector.broadcast %cst_37 : f32 to vector<1x1xf32>
      %50 = arith.mulf %48, %49 : vector<1x1xf32>
      %c0_38 = arith.constant 0 : index
      %c0_39 = arith.constant 0 : index
      %51 = vector.load %arg4[%c0_38, %c0_39] : memref<1x1xf32, #tpu.memory_space<vmem>>, vector<1x1xf32>
      tpu.vector_store %arg4[%c0_38, %c0_39], %50 {strides = array<i32>} : memref<1x1xf32, #tpu.memory_space<vmem>>, vector<1x1xf32>,
    } else {
    }
    return
  }
  func.func @transform_0(%arg0: i32, %arg1: i32) -> (i32, i32, i32) {
    %c1_i32 = arith.constant 1 : i32
    %0 = arith.muli %arg0, %c1_i32 : i32
    %1 = arith.addi %0, %arg1 : i32
    %c0_i32 = arith.constant 0 : i32
    %c0_i32_0 = arith.constant 0 : i32
    %c0_i32_1 = arith.constant 0 : i32
    return %c0_i32, %1, %c0_i32_0 : i32, i32, i32
  }
  func.func @transform_1(%arg0: i32, %arg1: i32) -> (i32, i32, i32) {
    %c1_i32 = arith.constant 1 : i32
    %0 = arith.muli %arg0, %c1_i32 : i32
    %1 = arith.addi %0, %arg1 : i32
    %c0_i32 = arith.constant 0 : i32
    %c0_i32_0 = arith.constant 0 : i32
    %c0_i32_1 = arith.constant 0 : i32
    return %c0_i32, %1, %c0_i32_0 : i32, i32, i32
  }
  func.func @transform_2(%arg0: i32, %arg1: i32) -> (i32, i32) {
    %c0_i32 = arith.constant 0 : i32
    %c0_i32_0 = arith.constant 0 : i32
    %c0_i32_1 = arith.constant 0 : i32
    return %c0_i32, %c0_i32_0 : i32, i32
  }
}

</mosaic_0001>

<bundles_post_ra>
// kernel: tpu_custom_call.1
= control target key start
LH: loop header
LB: loop body
LE: loop exit
PB: predicated region body
PF: predicated region fallthrough
CT: control target
= control target key end

     0   :  { %7 = vsyncpa [#allocation6], 0  ;;  %s363_s0 = inlined_call_operand.hbm [shape: f32[2,8,128], index: 0, kind: input, shape index: {}]   ;;  %s364_s1 = inlined_call_operand.hbm [shape: f32[2,8,128], index: 1, kind: input, shape index: {}]   ;;  %s365_s2 = inlined_call_operand.hbm [shape: f32[1,1], index: 2, kind: output, shape index: {}]  }
   0x1   :  { %8 = vsyncpa [#allocation9], 0 }
   0x2   :  { %9 = vsyncpa [#allocation7], 0  ;;  %s17_s11 = sshll.u32 %s363_s0, 4  ;;  %s325_s12 = smov [#allocation5]   ;;  %s18_s11 = int_to_ptr.hbm [resolvable:$true] %s17_s11 }
   0x3   :  { %s19_s13 = sshll.u32 %s325_s12, 4  ;;  %s33_s16 = sshll.u32 %s364_s1, 4  ;;  %s20_s13 = int_to_ptr.vmem [resolvable:$true] %s19_s13  ;;  %s34_s16 = int_to_ptr.hbm [resolvable:$true] %s33_s16 }
   0x4   :  { %s326_s17 = smov 128   ;;  %s327_s18 = smov 8  }
   0x5   :  { %25 = dma.hbm_to_vmem [thread:$0]  %s18_s11, 256, %s20_s13, [#allocation6], %s326_s17, %s326_s17, %s327_s18  }
   0x6   :  { %s328_s19 = smov [#allocation8]  }
   0x7   :  { %s35_s20 = sshll.u32 %s328_s19, 4  ;;  %s36_s20 = int_to_ptr.vmem [resolvable:$true] %s35_s20 }
   0x8   :  { %41 = dma.hbm_to_vmem [thread:$0]  %s34_s16, 256, %s36_s20, [#allocation9], %s326_s17, %s326_s17, %s327_s18  }
   0x9   :  { %319 = dma.done.wait [#allocation6], 256  }
   0xa   :  { %320 = vsyncadd [#allocation6], 4294967040 }
   0xb   :  { %321 = dma.done.wait [#allocation9], 256  }
   0xc   :  { %322 = vsyncadd [#allocation9], 4294967040  ;;  %v329_v0 = vmov 0.0   ;;  %v59_v1 = vld [vmem:[#allocation5] sm:$0xff]  ;;  %v60_v2 = vld [vmem:[#allocation5 + $0x8] sm:$0xff]  ;;  %vm118_vm1 = vcmask 1041409  }
   0xd   :  { %57 = vst [vmem:[#allocation3] sm:$0x3] %v329_v0  ;;  %v229_v3 = vmul.f32 -1.442695, %v59_v1  ;;  %v230_v4 = vmul.f32 -1.442695, %v60_v2 }
   0xe   :  { %56 = vst [vmem:[#allocation2] sm:$0x3] %v329_v0  ;;  %v99_v5 = vld [vmem:[#allocation8] sm:$0xff]  ;;  %v100_v6 = vld [vmem:[#allocation8 + $0x8] sm:$0xff]  ;;  %vm169_vm9 = vcmask 1041408   ;;  %s330_s0 = smov [#allocation10]  }
   0xf   :  { %58 = vst [vmem:[#allocation4] sm:$0x3] %v329_v0  ;;  %237 = vpow2.f32 %v229_v3  ;;  %v145_v7 = vmul.f32 %v99_v5, %v99_v5  ;;  %v146_v8 = vmul.f32 %v100_v6, %v100_v6  ;;  %s216_s1 = sshll.u32 %s330_s0, 4  ;;  %s218_s23 = sshll.u32 %s365_s2, 4  ;;  %vm209_vm14 = vcmask 0   ;;  %s217_s1 = int_to_ptr.vmem [resolvable:$true] %s216_s1  ;;  %s219_s23 = int_to_ptr.hbm [resolvable:$true] %s218_s23 }
  0x10   :  { %239 = vpow2.f32 %v230_v4 }
  0x11   :  { %v147_v9 = vrot.slane %v145_v7, 4  ;;  %v153_v10 = vrot.slane %v146_v8, 4 }
  0x13   :  { %v148_v14 = vadd.f32 %v147_v9, %v145_v7  ;;  %v154_v15 = vadd.f32 %v153_v10, %v146_v8 }
  0x14   :  { %v123_v10 = vld [vmem:[#allocation3] sm:$0x3] }
  0x15   :  { %v238_v11 = vpop.eup %237  ;;  %v149_v17 = vrot.slane %v148_v14, 2  ;;  %v155_v18 = vrot.slane %v154_v15, 2 }
  0x16   :  { %v240_v12 = vpop.eup %239  ;;  %v67_v13 = vadd.f32 1.0, %v238_v11  ;;  %v144_v29 = vld [vmem:[#allocation4] sm:$0x3] }
  0x17   :  { %v68_v16 = vadd.f32 1.0, %v240_v12  ;;  %v150_v19 = vadd.f32 %v149_v17, %v148_v14  ;;  %v156_v20 = vadd.f32 %v155_v18, %v154_v15  ;;  %v101_v12 = vld [vmem:[#allocation2] sm:$0x3] }
  0x18   :  { %241 = vrcp.f32 %v67_v13  ;;  %vm74_vm0 = vweird.f32 %v67_v13  ;;  %v78_v26 = vand.u32 2147483647, %v67_v13  ;;  %v80_v27 = vand.u32 2147483648, %v67_v13 }
  0x19   :  { %243 = vrcp.f32 %v68_v16  ;;  %v151_v22 = vrot.slane %v150_v19, 1  ;;  %v157_v23 = vrot.slane %v156_v20, 1  ;;  %vm89_vm3 = vweird.f32 %v68_v16 }
  0x1a   :  { %v95_v33 = vand.u32 2147483648, %v68_v16  ;;  %v93_v35 = vand.u32 2147483647, %v68_v16  ;;  %v81_v39 = vor.u32 1.1754944e-38, %v80_v27  ;;  %vm79_vm6 = vcmp.eq.f32.partialorder %v78_v26, 8.507059e+37 }
  0x1b   :  { %v152_v30 = vadd.f32 %v151_v22, %v150_v19  ;;  %v158_v31 = vadd.f32 %v157_v23, %v156_v20 }
  0x1c   :  { %v96_v42 = vor.u32 1.1754944e-38, %v95_v33  ;;  %vm94_vm8 = vcmp.eq.f32.partialorder %v93_v35, 8.507059e+37 }
  0x1d   :  { %v161_v36 = vsel %vm118_vm1, %v158_v31, %v152_v30 }
  0x1e   :  { %v242_v21 = vpop.eup %241  ;;  %v163_v38 = vadd.f32 %v161_v36, %v144_v29 }
  0x1f   :  { %v244_v24 = vpop.eup %243  ;;  %v70_v25 = vmul.f32 %v242_v21, %v67_v13  ;;  %vm75_vm2 = vweird.f32 %v242_v21 }
  0x20   :  { %v85_v28 = vmul.f32 %v244_v24, %v68_v16  ;;  %vm90_vm4 = vweird.f32 %v244_v24  ;;  %vm76_vm5 = vmor %vm74_vm0, %vm75_vm2  ;;  %164 = vst [vmem:[#allocation4] sm:$0x3] %v163_v38 }
  0x21   :  { %v71_v32 = vsub.f32 1.0, %v70_v25  ;;  %vm91_vm7 = vmor %vm89_vm3, %vm90_vm4 }
  0x22   :  { %v86_v34 = vsub.f32 1.0, %v85_v28 }
  0x23   :  { %v72_v37 = vmul.f32 %v242_v21, %v71_v32 }
  0x24   :  { %v87_v40 = vmul.f32 %v244_v24, %v86_v34 }
  0x25   :  { %v73_v41 = vadd.f32 %v242_v21, %v72_v37 }
  0x26   :  { %v88_v43 = vadd.f32 %v244_v24, %v87_v40 }
  0x27   :  { %v77_v44 = vsel %vm76_vm5, %v242_v21, %v73_v41  ;;  %v177_v22 = vld [vmem:[#allocation4] sm:$0x3] }
  0x28   :  { %v82_v45 = vsel %vm79_vm6, %v81_v39, %v77_v44  ;;  %v92_v46 = vsel %vm91_vm7, %v244_v24, %v88_v43  ;;  %v178_v23 = vsel %vm169_vm9, %v177_v22, 0.0 }
  0x29   :  { %v97_v47 = vsel %vm94_vm8, %v96_v42, %v92_v46  ;;  %v124_v48 = vmul.f32 %v82_v45, %v82_v45  ;;  %v102_v49 = vmul.f32 %v99_v5, %v82_v45 }
  0x2a   :  { %v125_v50 = vmul.f32 %v97_v47, %v97_v47  ;;  %v103_v51 = vmul.f32 %v100_v6, %v97_v47 }
  0x2b   :  { %v126_v52 = vrot.slane %v124_v48, 4  ;;  %v104_v53 = vrot.slane %v102_v49, 4 }
  0x2c   :  { %v132_v54 = vrot.slane %v125_v50, 4  ;;  %v110_v55 = vrot.slane %v103_v51, 4 }
  0x2d   :  { %v127_v56 = vadd.f32 %v126_v52, %v124_v48  ;;  %v105_v57 = vadd.f32 %v104_v53, %v102_v49 }
  0x2e   :  { %v133_v58 = vadd.f32 %v132_v54, %v125_v50  ;;  %v111_v59 = vadd.f32 %v110_v55, %v103_v51 }
  0x2f   :  { %v128_v60 = vrot.slane %v127_v56, 2  ;;  %v106_v61 = vrot.slane %v105_v57, 2 }
  0x30   :  { %v134_v62 = vrot.slane %v133_v58, 2  ;;  %v112_v63 = vrot.slane %v111_v59, 2 }
  0x31   :  { %v129_v0 = vadd.f32 %v128_v60, %v127_v56  ;;  %v107_v1 = vadd.f32 %v106_v61, %v105_v57 }
  0x32   :  { %v135_v2 = vadd.f32 %v134_v62, %v133_v58  ;;  %v113_v3 = vadd.f32 %v112_v63, %v111_v59 }
  0x33   :  { %v130_v4 = vrot.slane %v129_v0, 1  ;;  %v108_v5 = vrot.slane %v107_v1, 1 }
  0x34   :  { %v136_v7 = vrot.slane %v135_v2, 1  ;;  %v114_v6 = vrot.slane %v113_v3, 1 }
  0x35   :  { %v131_v8 = vadd.f32 %v130_v4, %v129_v0  ;;  %v109_v9 = vadd.f32 %v108_v5, %v107_v1 }
  0x36   :  { %v137_v11 = vadd.f32 %v136_v7, %v135_v2  ;;  %v115_v13 = vadd.f32 %v114_v6, %v113_v3 }
  0x38   :  { %v140_v14 = vsel %vm118_vm1, %v137_v11, %v131_v8  ;;  %v119_v15 = vsel %vm118_vm1, %v115_v13, %v109_v9 }
  0x39   :  { %v142_v16 = vadd.f32 %v140_v14, %v123_v10  ;;  %v121_v17 = vadd.f32 %v119_v15, %v101_v12 }
  0x3b   :  { %143 = vst [vmem:[#allocation3] sm:$0x3] %v142_v16 }
  0x3c   :  { %122 = vst [vmem:[#allocation2] sm:$0x3] %v121_v17 }
  0x42   :  { %v173_v18 = vld [vmem:[#allocation3] sm:$0x3] }
  0x43   :  { %v174_v19 = vsel %vm169_vm9, %v173_v18, 0.0  ;;  %v168_v20 = vld [vmem:[#allocation2] sm:$0x3] }
  0x44   :  { %175 = vadd.xlane.f32.xlu0 %v174_v19  ;;  %v170_v21 = vsel %vm169_vm9, %v168_v20, 0.0 }
  0x45   :  { %171 = vadd.xlane.f32.xlu1 %v170_v21 }
  0x4c   :  { %179 = vadd.xlane.f32.xlu0 %v178_v23 }
  0xb7   :  { %v176_v24 = vpop.xlane.xlu0 %175 }
  0xb8   :  { %v182_v26 = vadd.f32 0.001, %v176_v24  ;;  %v172_v33 = vpop.xlane.xlu1 %171 }
  0xb9   :  { %v181_v37 = vmul.f32 2.0, %v172_v33 }
  0xbf   :  { %v180_v25 = vpop.xlane.xlu0 %179 }
  0xc0   :  { %v183_v27 = vadd.f32 0.001, %v180_v25 }
  0xc2   :  { %v184_v28 = vadd.f32 %v183_v27, %v182_v26 }
  0xc4   :  { %245 = vrcp.f32 %v184_v28  ;;  %v196_v32 = vand.u32 2147483648, %v184_v28  ;;  %v194_v35 = vand.u32 2147483647, %v184_v28  ;;  %vm190_vm11 = vweird.f32 %v184_v28 }
  0xc6   :  { %v197_v38 = vor.u32 1.1754944e-38, %v196_v32  ;;  %vm195_vm13 = vcmp.eq.f32.partialorder %v194_v35, 8.507059e+37 }
  0xca   :  { %v246_v29 = vpop.eup %245 }
  0xcb   :  { %v186_v30 = vmul.f32 %v246_v29, %v184_v28  ;;  %vm191_vm10 = vweird.f32 %v246_v29 }
  0xcc   :  { %vm192_vm12 = vmor %vm190_vm11, %vm191_vm10 }
  0xcd   :  { %v187_v31 = vsub.f32 1.0, %v186_v30 }
  0xcf   :  { %v188_v34 = vmul.f32 %v246_v29, %v187_v31 }
  0xd1   :  { %v189_v36 = vadd.f32 %v246_v29, %v188_v34 }
  0xd3   :  { %v193_v39 = vsel %vm192_vm12, %v246_v29, %v189_v36 }
  0xd4   :  { %v198_v40 = vsel %vm195_vm13, %v197_v38, %v193_v39 }
  0xd5   :  { %v199_v41 = vmul.f32 %v198_v40, %v181_v37 }
  0xd7   :  { %v200_v42 = vsub.f32 1.0, %v199_v41 }
  0xd9   :  { %v201_v43 = vsel %vm169_vm9, %v200_v42, 0.0 }
  0xda   :  { %v202_v44 = vrot.slane %v201_v43, 4 }
  0xdc   :  { %v203_v45 = vadd.f32 %v202_v44, %v201_v43 }
  0xde   :  { %v204_v46 = vrot.slane %v203_v45, 2 }
  0xe0   :  { %v205_v47 = vadd.f32 %v204_v46, %v203_v45 }
  0xe2   :  { %v206_v48 = vrot.slane %v205_v47, 1 }
  0xe4   :  { %v207_v49 = vadd.f32 %v206_v48, %v205_v47 }
  0xe6   :  { %v208_v50 = vmul.f32 0.5, %v207_v49 }
  0xe8   :  { %210 = vst.msk [vmem:[#allocation10] sm:$0x1] %vm209_vm14, %v208_v50 }
  0xe9   :  { %221 = dma.vmem_to_hbm [thread:$0]  %s217_s1, 16, %s219_s23, [#allocation7]  }
  0xea   :  { %323 = dma.done.wait [#allocation7], 16  }
  0xeb   :  { %324 = vsyncadd [#allocation7], 4294967280 }
  0xec   :  { %226 = vsyncpa [#allocation6], 1 }
  0xed   :  { %227 = vsyncpa [#allocation9], 1 }
  0xee   :  { %228 = vsyncpa [#allocation7], 1 }

</bundles_post_ra>
